<compile_context>
chip_gen: v7x
topology: tpu7x:2x2x1
jax: 0.10.0
libtpu: 0.0.40
codegen_flags: <defaults>
</compile_context>

<pallas_src>
import functools

import jax
import jax.numpy as jnp
from jax import lax
from jax.experimental import pallas as pl
from jax.experimental.pallas import tpu as pltpu


# ----------------------------------------------------------------------------
# Pallas kernels
# ----------------------------------------------------------------------------
def _gemm_bias_relu_kernel(x_ref, w_ref, b_ref, o_ref, *, apply_relu):
    # x: (TM, K) bf16, w: (K, N) bf16 (resident), b: (1, N) f32 (resident).
    acc = jnp.dot(x_ref[...], w_ref[...], preferred_element_type=jnp.float32)
    acc = acc + b_ref[...]                      # broadcasts over rows
    if apply_relu:
        acc = jnp.maximum(acc, 0.0)
    o_ref[...] = acc.astype(o_ref.dtype)


def _fused_head_kernel(x_ref, w1_ref, b1_ref, w2_ref, b2_ref, o_ref):
    # Fused Linear(n_flatten,512)+ReLU followed by Linear(512,A_pad):
    # the 512-wide hidden stays in VMEM/vregs, never touches HBM.
    h = jnp.dot(x_ref[...], w1_ref[...], preferred_element_type=jnp.float32)
    h = jnp.maximum(h + b1_ref[...], 0.0)
    q = jnp.dot(h.astype(w2_ref.dtype), w2_ref[...],
                preferred_element_type=jnp.float32)
    o_ref[...] = (q + b2_ref[...]).astype(o_ref.dtype)


# ----------------------------------------------------------------------------
# Pallas wrappers
# ----------------------------------------------------------------------------
_VMEM_BUDGET_BYTES = 16 * 1024 * 1024   # conservative: fits v7x scoped VMEM w/ headroom


def _pick_tile_m(m, k, n):
    """Rows per grid step: largest multiple of 16 whose double-buffered bf16
    input tile + f32 output tile stay well under the VMEM budget."""
    per_row = 2 * (k * 2 + n * 4)
    t = max(16, min(1024, _VMEM_BUDGET_BYTES // max(per_row, 1)))
    t = (t // 16) * 16
    return m if m <= t else t


def gemm_bias_relu(x, w, b, *, relu, out_dtype):
    """x: (M, K) bf16, w: (K, N) bf16, b: (N,) f32 -> (M, N) out_dtype."""
    M, K = x.shape
    K2, N = w.shape
    assert K == K2, (K, K2)
    tm = _pick_tile_m(M, K, N)
    grid = (pl.cdiv(M, tm),)
    return pl.pallas_call(
        functools.partial(_gemm_bias_relu_kernel, apply_relu=relu),
        out_shape=jax.ShapeDtypeStruct((M, N), out_dtype),
        grid=grid,
        in_specs=[
            pl.BlockSpec((tm, K), lambda i: (i, 0)),   # streamed row tiles
            pl.BlockSpec((K, N), lambda i: (0, 0)),    # weights resident
            pl.BlockSpec((1, N), lambda i: (0, 0)),    # bias resident
        ],
        out_specs=pl.BlockSpec((tm, N), lambda i: (i, 0)),
        compiler_params=pltpu.CompilerParams(dimension_semantics=("parallel",)),
    )(x, w, b.reshape(1, N).astype(jnp.float32))


def fused_head(x, w1, b1, w2, b2):
    """relu(x @ w1 + b1) @ w2 + b2 in a single kernel, tiled over batch rows."""
    B, K1 = x.shape
    H = w1.shape[1]
    A = w2.shape[1]           # already padded to a multiple of 128 (lane-dense)
    tb = _pick_tile_m(B, K1 + H, H + A)
    grid = (pl.cdiv(B, tb),)
    return pl.pallas_call(
        _fused_head_kernel,
        out_shape=jax.ShapeDtypeStruct((B, A), jnp.float32),
        grid=grid,
        in_specs=[
            pl.BlockSpec((tb, K1), lambda i: (i, 0)),
            pl.BlockSpec((K1, H), lambda i: (0, 0)),
            pl.BlockSpec((1, H), lambda i: (0, 0)),
            pl.BlockSpec((H, A), lambda i: (0, 0)),
            pl.BlockSpec((1, A), lambda i: (0, 0)),
        ],
        out_specs=pl.BlockSpec((tb, A), lambda i: (i, 0)),
        compiler_params=pltpu.CompilerParams(dimension_semantics=("parallel",)),
    )(x, w1, b1.reshape(1, H).astype(jnp.float32),
      w2, b2.reshape(1, A).astype(jnp.float32))


# ----------------------------------------------------------------------------
# NHWC im2col glue (plain JAX, static shapes)
# ----------------------------------------------------------------------------
# TODO(synk): gather the patches inside the Pallas kernel (BlockSpec/pl.ds over
# the NHWC input) so the expanded im2col matrix is never materialized in HBM.
def _im2col_nhwc(x, kh, kw, stride):
    """x: (N, H, W, C) -> (N*OH*OW, kh*kw*C), minor order (kh, kw, C)."""
    N, H, W, C = x.shape
    OH = (H - kh) // stride + 1
    OW = (W - kw) // stride + 1
    taps = []
    for i in range(kh):
        for j in range(kw):
            taps.append(
                x[:, i:i + stride * (OH - 1) + 1:stride,
                     j:j + stride * (OW - 1) + 1:stride, :])   # (N, OH, OW, C)
    patches = jnp.stack(taps, axis=3)                          # (N, OH, OW, kh*kw, C)
    cols = patches.reshape(N * OH * OW, kh * kw * C)
    return cols, OH, OW


def conv2d_nhwc(x, w_flat, b, *, stride, kh, kw):
    """x: (N,H,W,Cin) bf16; w_flat: (kh*kw*Cin, Cout) bf16; b: (Cout,) f32."""
    N = x.shape[0]
    cols, OH, OW = _im2col_nhwc(x, kh, kw, stride)
    y = gemm_bias_relu(cols, w_flat, b, relu=True, out_dtype=jnp.bfloat16)
    return y.reshape(N, OH, OW, w_flat.shape[1])               # stays NHWC


# ----------------------------------------------------------------------------
# Parameter construction (PyTorch layouts) and kernel-layout preparation
# ----------------------------------------------------------------------------
def _uniform(key, shape, fan_in):
    bound = 1.0 / (fan_in ** 0.5)
    return jax.random.uniform(key, shape, jnp.float32, -bound, bound)


def init_params(key, in_channels, spatial, num_actions):
    ks = jax.random.split(key, 10)
    c1_w = _uniform(ks[0], (32, in_channels, 8, 8), in_channels * 8 * 8)
    c1_b = _uniform(ks[1], (32,), in_channels * 8 * 8)
    c2_w = _uniform(ks[2], (64, 32, 4, 4), 32 * 4 * 4)
    c2_b = _uniform(ks[3], (64,), 32 * 4 * 4)
    c3_w = _uniform(ks[4], (64, 64, 3, 3), 64 * 3 * 3)
    c3_b = _uniform(ks[5], (64,), 64 * 3 * 3)
    o1 = (spatial - 8) // 4 + 1
    o2 = (o1 - 4) // 2 + 1
    o3 = (o2 - 3) // 1 + 1
    n_flatten = 64 * o3 * o3
    l1_w = _uniform(ks[6], (512, n_flatten), n_flatten)
    l1_b = _uniform(ks[7], (512,), n_flatten)
    l2_w = _uniform(ks[8], (num_actions, 512), 512)
    l2_b = _uniform(ks[9], (num_actions,), 512)
    return dict(c1_w=c1_w, c1_b=c1_b, c2_w=c2_w, c2_b=c2_b, c3_w=c3_w, c3_b=c3_b,
                l1_w=l1_w, l1_b=l1_b, l2_w=l2_w, l2_b=l2_b)


def prepare_params(params, spatial, num_actions):
    """One-time conversion of PyTorch-layout params to kernel layouts:
    conv weights -> (kh*kw*Cin, Cout) bf16 (matches NHWC im2col order);
    l1 weight columns permuted from NCHW-flatten to NHWC-flatten order;
    l2 weight/bias zero-padded to 128 output lanes (lane-dense final store)."""
    bf16, f32 = jnp.bfloat16, jnp.float32

    def conv_w(w):
        cout, cin, kh, kw = w.shape
        return w.transpose(2, 3, 1, 0).reshape(kh * kw * cin, cout).astype(bf16)

    o1 = (spatial - 8) // 4 + 1
    o2 = (o1 - 4) // 2 + 1
    o3 = (o2 - 3) // 1 + 1

    # (512, 64*o3*o3) in (c, h, w) order  ->  (o3*o3*64, 512) in (h, w, c) order.
    l1_w = params["l1_w"].reshape(512, 64, o3, o3).transpose(2, 3, 1, 0)
    l1_w = l1_w.reshape(o3 * o3 * 64, 512).astype(bf16)

    a_pad = ((num_actions + 127) // 128) * 128
    l2_w = jnp.zeros((512, a_pad), f32).at[:, :num_actions].set(params["l2_w"].T)
    l2_b = jnp.zeros((a_pad,), f32).at[:num_actions].set(params["l2_b"])

    return {
        "c1_w": conv_w(params["c1_w"]), "c1_b": params["c1_b"].astype(f32),
        "c2_w": conv_w(params["c2_w"]), "c2_b": params["c2_b"].astype(f32),
        "c3_w": conv_w(params["c3_w"]), "c3_b": params["c3_b"].astype(f32),
        "l1_w": l1_w, "l1_b": params["l1_b"].astype(f32),
        "l2_w": l2_w.astype(bf16), "l2_b": l2_b,
    }


# ----------------------------------------------------------------------------
# Full forward pass (Network.forward)
# ----------------------------------------------------------------------------
def network_forward(kparams, x, *, num_actions):
    """x: (N, C, H, W) float32 (PyTorch layout) -> q: (N, num_actions) float32."""
    h = x.transpose(0, 2, 3, 1).astype(jnp.bfloat16)   # single NCHW -> NHWC shuffle
    h = conv2d_nhwc(h, kparams["c1_w"], kparams["c1_b"], stride=4, kh=8, kw=8)
    h = conv2d_nhwc(h, kparams["c2_w"], kparams["c2_b"], stride=2, kh=4, kw=4)
    h = conv2d_nhwc(h, kparams["c3_w"], kparams["c3_b"], stride=1, kh=3, kw=3)
    n = h.shape[0]
    h = h.reshape(n, -1)                               # NHWC flatten (l1_w pre-permuted)
    q_pad = fused_head(h, kparams["l1_w"], kparams["l1_b"],
                       kparams["l2_w"], kparams["l2_b"])
    return q_pad[:, :num_actions]


# ----------------------------------------------------------------------------
# References for correctness checks
# ----------------------------------------------------------------------------
def network_forward_ref(params, x):
    """Pure-f32 PyTorch-equivalent reference."""
    def conv(h, w, b, s):
        y = lax.conv_general_dilated(h, w, (s, s), "VALID",
                                     dimension_numbers=("NCHW", "OIHW", "NCHW"))
        return jnp.maximum(y + b[None, :, None, None], 0.0)
    h = conv(x, params["c1_w"], params["c1_b"], 4)
    h = conv(h, params["c2_w"], params["c2_b"], 2)
    h = conv(h, params["c3_w"], params["c3_b"], 1)
    h = h.reshape(h.shape[0], -1)
    h = jnp.maximum(h @ params["l1_w"].T + params["l1_b"], 0.0)
    return h @ params["l2_w"].T + params["l2_b"]


def network_forward_ref_bf16(params, x):
    """Quantization-matched reference: bf16 GEMM inputs, f32 accumulation,
    bf16 inter-layer activations — mirrors the Pallas path exactly."""
    bf16 = jnp.bfloat16

    def conv(h, w, b, s):
        y = lax.conv_general_dilated(h.astype(bf16), w.astype(bf16), (s, s), "VALID",
                                     dimension_numbers=("NCHW", "OIHW", "NCHW"),
                                     preferred_element_type=jnp.float32)
        return jnp.maximum(y + b[None, :, None, None], 0.0).astype(bf16)

    h = conv(x, params["c1_w"], params["c1_b"], 4)
    h = conv(h, params["c2_w"], params["c2_b"], 2)
    h = conv(h, params["c3_w"], params["c3_b"], 1)
    h = h.reshape(h.shape[0], -1)                      # bf16, NCHW flatten order
    h1 = jnp.maximum(
        jnp.dot(h, params["l1_w"].T.astype(bf16),
                preferred_element_type=jnp.float32) + params["l1_b"], 0.0)
    return (jnp.dot(h1.astype(bf16), params["l2_w"].T.astype(bf16),
                    preferred_element_type=jnp.float32) + params["l2_b"])


# ----------------------------------------------------------------------------
if __name__ == "__main__":
    # Small, valid shapes: obs space (4, 36, 36) -> 8x8 -> 3x3 -> 1x1 feature maps.
    batch, channels, spatial, num_actions = 2, 4, 36, 6

    key = jax.random.PRNGKey(0)
    k_params, k_x = jax.random.split(key)
    params = init_params(k_params, channels, spatial, num_actions)
    kparams = prepare_params(params, spatial, num_actions)
    x = jax.random.uniform(k_x, (batch, channels, spatial, spatial), jnp.float32)

    fwd = jax.jit(functools.partial(network_forward, num_actions=num_actions))
    q = jax.block_until_ready(fwd(kparams, x))
    assert q.shape == (batch, num_actions), q.shape

    # Tight check vs a reference with identical bf16 quantization.
    q_bf16_ref = network_forward_ref_bf16(params, x)
    err_q = float(jnp.max(jnp.abs(q - q_bf16_ref)))
    assert jnp.allclose(q, q_bf16_ref, atol=2e-3, rtol=2e-3), err_q

    # Loose sanity check vs the pure-f32 PyTorch-equivalent reference.
    q_f32_ref = network_forward_ref(params, x)
    err_f = float(jnp.max(jnp.abs(q - q_f32_ref)))
    assert jnp.allclose(q, q_f32_ref, atol=5e-2, rtol=5e-2), err_f

    print("KERNEL_OK")
</pallas_src>

<mosaic_0001>
module attributes {stable_mosaic.version = 11 : i64} {
  func.func @_gemm_bias_relu_kernel(%arg0: i32, %arg1: memref<128x256xbf16, #tpu.memory_space<vmem>>, %arg2: memref<256x32xbf16, #tpu.memory_space<vmem>>, %arg3: memref<1x32xf32, #tpu.memory_space<vmem>>, %arg4: memref<128x32xbf16, #tpu.memory_space<vmem>>) attributes {dimension_semantics = [#tpu.dimension_semantics<parallel>], iteration_bounds = array<i64: 1>, scalar_prefetch = 0 : i64, scratch_operands = 0 : i64, tpu.core_type = #tpu.core_type<tc>, window_params = [{transform_indices = @transform_0, window_bounds = array<i64: 128, 256>}, {pipeline_mode = #tpu.pipeline_mode<synchronous>, transform_indices = @transform_1, window_bounds = array<i64: 256, 32>}, {pipeline_mode = #tpu.pipeline_mode<synchronous>, transform_indices = @transform_2, window_bounds = array<i64: 1, 32>}, {transform_indices = @transform_3, window_bounds = array<i64: 128, 32>}]} {
    %c0 = arith.constant 0 : index
    %c0_0 = arith.constant 0 : index
    %0 = vector.load %arg1[%c0, %c0_0] : memref<128x256xbf16, #tpu.memory_space<vmem>>, vector<128x256xbf16>
    %c0_1 = arith.constant 0 : index
    %c0_2 = arith.constant 0 : index
    %1 = vector.load %arg2[%c0_1, %c0_2] : memref<256x32xbf16, #tpu.memory_space<vmem>>, vector<256x32xbf16>
    %cst = arith.constant dense<0.000000e+00> : vector<128x32xf32>
    %2 = tpu.matmul %0, %1, %cst {dimension_numbers = #tpu.dot_dimension_numbers<[1], [0], [0], [1], [0, 0, 1, 1], [], []>} : vector<128x256xbf16>, vector<256x32xbf16>, vector<128x32xf32> -> vector<128x32xf32>
    %c0_3 = arith.constant 0 : index
    %c0_4 = arith.constant 0 : index
    %3 = vector.load %arg3[%c0_3, %c0_4] : memref<1x32xf32, #tpu.memory_space<vmem>>, vector<1x32xf32>
    %4 = vector.broadcast %3 : vector<1x32xf32> to vector<128x32xf32>
    %5 = arith.addf %2, %4 : vector<128x32xf32>
    %cst_5 = arith.constant 0.000000e+00 : f32
    %6 = vector.broadcast %cst_5 : f32 to vector<128x32xf32>
    %7 = arith.maximumf %5, %6 : vector<128x32xf32>
    %8 = arith.truncf %7 : vector<128x32xf32> to vector<128x32xbf16>
    %c0_6 = arith.constant 0 : index
    %c0_7 = arith.constant 0 : index
    %9 = vector.load %arg4[%c0_6, %c0_7] : memref<128x32xbf16, #tpu.memory_space<vmem>>, vector<128x32xbf16>
    tpu.vector_store %arg4[%c0_6, %c0_7], %8 {strides = array<i32>} : memref<128x32xbf16, #tpu.memory_space<vmem>>, vector<128x32xbf16>,
    return
  }
  func.func @transform_0(%arg0: i32) -> (i32, i32) {
    %c0_i32 = arith.constant 0 : i32
    %c0_i32_0 = arith.constant 0 : i32
    return %arg0, %c0_i32 : i32, i32
  }
  func.func @transform_1(%arg0: i32) -> (i32, i32) {
    %c0_i32 = arith.constant 0 : i32
    %c0_i32_0 = arith.constant 0 : i32
    %c0_i32_1 = arith.constant 0 : i32
    return %c0_i32, %c0_i32_0 : i32, i32
  }
  func.func @transform_2(%arg0: i32) -> (i32, i32) {
    %c0_i32 = arith.constant 0 : i32
    %c0_i32_0 = arith.constant 0 : i32
    %c0_i32_1 = arith.constant 0 : i32
    return %c0_i32, %c0_i32_0 : i32, i32
  }
  func.func @transform_3(%arg0: i32) -> (i32, i32) {
    %c0_i32 = arith.constant 0 : i32
    %c0_i32_0 = arith.constant 0 : i32
    return %arg0, %c0_i32 : i32, i32
  }
}

module attributes {stable_mosaic.version = 11 : i64} {
  func.func @_gemm_bias_relu_kernel(%arg0: i32, %arg1: memref<18x512xbf16, #tpu.memory_space<vmem>>, %arg2: memref<512x64xbf16, #tpu.memory_space<vmem>>, %arg3: memref<1x64xf32, #tpu.memory_space<vmem>>, %arg4: memref<18x64xbf16, #tpu.memory_space<vmem>>) attributes {dimension_semantics = [#tpu.dimension_semantics<parallel>], iteration_bounds = array<i64: 1>, scalar_prefetch = 0 : i64, scratch_operands = 0 : i64, tpu.core_type = #tpu.core_type<tc>, window_params = [{transform_indices = @transform_0, window_bounds = array<i64: 18, 512>}, {pipeline_mode = #tpu.pipeline_mode<synchronous>, transform_indices = @transform_1, window_bounds = array<i64: 512, 64>}, {pipeline_mode = #tpu.pipeline_mode<synchronous>, transform_indices = @transform_2, window_bounds = array<i64: 1, 64>}, {transform_indices = @transform_3, window_bounds = array<i64: 18, 64>}]} {
    %c0 = arith.constant 0 : index
    %c0_0 = arith.constant 0 : index
    %0 = vector.load %arg1[%c0, %c0_0] : memref<18x512xbf16, #tpu.memory_space<vmem>>, vector<18x512xbf16>
    %c0_1 = arith.constant 0 : index
    %c0_2 = arith.constant 0 : index
    %1 = vector.load %arg2[%c0_1, %c0_2] : memref<512x64xbf16, #tpu.memory_space<vmem>>, vector<512x64xbf16>
    %cst = arith.constant dense<0.000000e+00> : vector<18x64xf32>
    %2 = tpu.matmul %0, %1, %cst {dimension_numbers = #tpu.dot_dimension_numbers<[1], [0], [0], [1], [0, 0, 1, 1], [], []>} : vector<18x512xbf16>, vector<512x64xbf16>, vector<18x64xf32> -> vector<18x64xf32>
    %c0_3 = arith.constant 0 : index
    %c0_4 = arith.constant 0 : index
    %3 = vector.load %arg3[%c0_3, %c0_4] : memref<1x64xf32, #tpu.memory_space<vmem>>, vector<1x64xf32>
    %4 = vector.broadcast %3 : vector<1x64xf32> to vector<18x64xf32>
    %5 = arith.addf %2, %4 : vector<18x64xf32>
    %cst_5 = arith.constant 0.000000e+00 : f32
    %6 = vector.broadcast %cst_5 : f32 to vector<18x64xf32>
    %7 = arith.maximumf %5, %6 : vector<18x64xf32>
    %8 = arith.truncf %7 : vector<18x64xf32> to vector<18x64xbf16>
    %c0_6 = arith.constant 0 : index
    %c0_7 = arith.constant 0 : index
    %9 = vector.load %arg4[%c0_6, %c0_7] : memref<18x64xbf16, #tpu.memory_space<vmem>>, vector<18x64xbf16>
    tpu.vector_store %arg4[%c0_6, %c0_7], %8 {strides = array<i32>} : memref<18x64xbf16, #tpu.memory_space<vmem>>, vector<18x64xbf16>,
    return
  }
  func.func @transform_0(%arg0: i32) -> (i32, i32) {
    %c0_i32 = arith.constant 0 : i32
    %c0_i32_0 = arith.constant 0 : i32
    return %arg0, %c0_i32 : i32, i32
  }
  func.func @transform_1(%arg0: i32) -> (i32, i32) {
    %c0_i32 = arith.constant 0 : i32
    %c0_i32_0 = arith.constant 0 : i32
    %c0_i32_1 = arith.constant 0 : i32
    return %c0_i32, %c0_i32_0 : i32, i32
  }
  func.func @transform_2(%arg0: i32) -> (i32, i32) {
    %c0_i32 = arith.constant 0 : i32
    %c0_i32_0 = arith.constant 0 : i32
    %c0_i32_1 = arith.constant 0 : i32
    return %c0_i32, %c0_i32_0 : i32, i32
  }
  func.func @transform_3(%arg0: i32) -> (i32, i32) {
    %c0_i32 = arith.constant 0 : i32
    %c0_i32_0 = arith.constant 0 : i32
    return %arg0, %c0_i32 : i32, i32
  }
}

module attributes {stable_mosaic.version = 11 : i64} {
  func.func @_gemm_bias_relu_kernel(%arg0: i32, %arg1: memref<2x576xbf16, #tpu.memory_space<vmem>>, %arg2: memref<576x64xbf16, #tpu.memory_space<vmem>>, %arg3: memref<1x64xf32, #tpu.memory_space<vmem>>, %arg4: memref<2x64xbf16, #tpu.memory_space<vmem>>) attributes {dimension_semantics = [#tpu.dimension_semantics<parallel>], iteration_bounds = array<i64: 1>, scalar_prefetch = 0 : i64, scratch_operands = 0 : i64, tpu.core_type = #tpu.core_type<tc>, window_params = [{transform_indices = @transform_0, window_bounds = array<i64: 2, 576>}, {pipeline_mode = #tpu.pipeline_mode<synchronous>, transform_indices = @transform_1, window_bounds = array<i64: 576, 64>}, {pipeline_mode = #tpu.pipeline_mode<synchronous>, transform_indices = @transform_2, window_bounds = array<i64: 1, 64>}, {transform_indices = @transform_3, window_bounds = array<i64: 2, 64>}]} {
    %c0 = arith.constant 0 : index
    %c0_0 = arith.constant 0 : index
    %0 = vector.load %arg1[%c0, %c0_0] : memref<2x576xbf16, #tpu.memory_space<vmem>>, vector<2x576xbf16>
    %c0_1 = arith.constant 0 : index
    %c0_2 = arith.constant 0 : index
    %1 = vector.load %arg2[%c0_1, %c0_2] : memref<576x64xbf16, #tpu.memory_space<vmem>>, vector<576x64xbf16>
    %cst = arith.constant dense<0.000000e+00> : vector<2x64xf32>
    %2 = tpu.matmul %0, %1, %cst {dimension_numbers = #tpu.dot_dimension_numbers<[1], [0], [0], [1], [0, 0, 1, 1], [], []>} : vector<2x576xbf16>, vector<576x64xbf16>, vector<2x64xf32> -> vector<2x64xf32>
    %c0_3 = arith.constant 0 : index
    %c0_4 = arith.constant 0 : index
    %3 = vector.load %arg3[%c0_3, %c0_4] : memref<1x64xf32, #tpu.memory_space<vmem>>, vector<1x64xf32>
    %4 = vector.broadcast %3 : vector<1x64xf32> to vector<2x64xf32>
    %5 = arith.addf %2, %4 : vector<2x64xf32>
    %cst_5 = arith.constant 0.000000e+00 : f32
    %6 = vector.broadcast %cst_5 : f32 to vector<2x64xf32>
    %7 = arith.maximumf %5, %6 : vector<2x64xf32>
    %8 = arith.truncf %7 : vector<2x64xf32> to vector<2x64xbf16>
    %c0_6 = arith.constant 0 : index
    %c0_7 = arith.constant 0 : index
    %9 = vector.load %arg4[%c0_6, %c0_7] : memref<2x64xbf16, #tpu.memory_space<vmem>>, vector<2x64xbf16>
    tpu.vector_store %arg4[%c0_6, %c0_7], %8 {strides = array<i32>} : memref<2x64xbf16, #tpu.memory_space<vmem>>, vector<2x64xbf16>,
    return
  }
  func.func @transform_0(%arg0: i32) -> (i32, i32) {
    %c0_i32 = arith.constant 0 : i32
    %c0_i32_0 = arith.constant 0 : i32
    return %arg0, %c0_i32 : i32, i32
  }
  func.func @transform_1(%arg0: i32) -> (i32, i32) {
    %c0_i32 = arith.constant 0 : i32
    %c0_i32_0 = arith.constant 0 : i32
    %c0_i32_1 = arith.constant 0 : i32
    return %c0_i32, %c0_i32_0 : i32, i32
  }
  func.func @transform_2(%arg0: i32) -> (i32, i32) {
    %c0_i32 = arith.constant 0 : i32
    %c0_i32_0 = arith.constant 0 : i32
    %c0_i32_1 = arith.constant 0 : i32
    return %c0_i32, %c0_i32_0 : i32, i32
  }
  func.func @transform_3(%arg0: i32) -> (i32, i32) {
    %c0_i32 = arith.constant 0 : i32
    %c0_i32_0 = arith.constant 0 : i32
    return %arg0, %c0_i32 : i32, i32
  }
}

module attributes {stable_mosaic.version = 11 : i64} {
  func.func @_fused_head_kernel(%arg0: i32, %arg1: memref<2x64xbf16, #tpu.memory_space<vmem>>, %arg2: memref<64x512xbf16, #tpu.memory_space<vmem>>, %arg3: memref<1x512xf32, #tpu.memory_space<vmem>>, %arg4: memref<512x128xbf16, #tpu.memory_space<vmem>>, %arg5: memref<1x128xf32, #tpu.memory_space<vmem>>, %arg6: memref<2x128xf32, #tpu.memory_space<vmem>>) attributes {dimension_semantics = [#tpu.dimension_semantics<parallel>], iteration_bounds = array<i64: 1>, scalar_prefetch = 0 : i64, scratch_operands = 0 : i64, tpu.core_type = #tpu.core_type<tc>, window_params = [{transform_indices = @transform_0, window_bounds = array<i64: 2, 64>}, {pipeline_mode = #tpu.pipeline_mode<synchronous>, transform_indices = @transform_1, window_bounds = array<i64: 64, 512>}, {pipeline_mode = #tpu.pipeline_mode<synchronous>, transform_indices = @transform_2, window_bounds = array<i64: 1, 512>}, {pipeline_mode = #tpu.pipeline_mode<synchronous>, transform_indices = @transform_3, window_bounds = array<i64: 512, 128>}, {pipeline_mode = #tpu.pipeline_mode<synchronous>, transform_indices = @transform_4, window_bounds = array<i64: 1, 128>}, {transform_indices = @transform_5, window_bounds = array<i64: 2, 128>}]} {
    %c0 = arith.constant 0 : index
    %c0_0 = arith.constant 0 : index
    %0 = vector.load %arg1[%c0, %c0_0] : memref<2x64xbf16, #tpu.memory_space<vmem>>, vector<2x64xbf16>
    %c0_1 = arith.constant 0 : index
    %c0_2 = arith.constant 0 : index
    %1 = vector.load %arg2[%c0_1, %c0_2] : memref<64x512xbf16, #tpu.memory_space<vmem>>, vector<64x512xbf16>
    %cst = arith.constant dense<0.000000e+00> : vector<2x512xf32>
    %2 = tpu.matmul %0, %1, %cst {dimension_numbers = #tpu.dot_dimension_numbers<[1], [0], [0], [1], [0, 0, 1, 1], [], []>} : vector<2x64xbf16>, vector<64x512xbf16>, vector<2x512xf32> -> vector<2x512xf32>
    %c0_3 = arith.constant 0 : index
    %c0_4 = arith.constant 0 : index
    %3 = vector.load %arg3[%c0_3, %c0_4] : memref<1x512xf32, #tpu.memory_space<vmem>>, vector<1x512xf32>
    %4 = vector.broadcast %3 : vector<1x512xf32> to vector<2x512xf32>
    %5 = arith.addf %2, %4 : vector<2x512xf32>
    %cst_5 = arith.constant 0.000000e+00 : f32
    %6 = vector.broadcast %cst_5 : f32 to vector<2x512xf32>
    %7 = arith.maximumf %5, %6 : vector<2x512xf32>
    %8 = arith.truncf %7 : vector<2x512xf32> to vector<2x512xbf16>
    %c0_6 = arith.constant 0 : index
    %c0_7 = arith.constant 0 : index
    %9 = vector.load %arg4[%c0_6, %c0_7] : memref<512x128xbf16, #tpu.memory_space<vmem>>, vector<512x128xbf16>
    %cst_8 = arith.constant dense<0.000000e+00> : vector<2x128xf32>
    %10 = tpu.matmul %8, %9, %cst_8 {dimension_numbers = #tpu.dot_dimension_numbers<[1], [0], [0], [1], [0, 0, 1, 1], [], []>} : vector<2x512xbf16>, vector<512x128xbf16>, vector<2x128xf32> -> vector<2x128xf32>
    %c0_9 = arith.constant 0 : index
    %c0_10 = arith.constant 0 : index
    %11 = vector.load %arg5[%c0_9, %c0_10] : memref<1x128xf32, #tpu.memory_space<vmem>>, vector<1x128xf32>
    %12 = vector.broadcast %11 : vector<1x128xf32> to vector<2x128xf32>
    %13 = arith.addf %10, %12 : vector<2x128xf32>
    %c0_11 = arith.constant 0 : index
    %c0_12 = arith.constant 0 : index
    %14 = vector.load %arg6[%c0_11, %c0_12] : memref<2x128xf32, #tpu.memory_space<vmem>>, vector<2x128xf32>
    tpu.vector_store %arg6[%c0_11, %c0_12], %13 {strides = array<i32>} : memref<2x128xf32, #tpu.memory_space<vmem>>, vector<2x128xf32>,
    return
  }
  func.func @transform_0(%arg0: i32) -> (i32, i32) {
    %c0_i32 = arith.constant 0 : i32
    %c0_i32_0 = arith.constant 0 : i32
    return %arg0, %c0_i32 : i32, i32
  }
  func.func @transform_1(%arg0: i32) -> (i32, i32) {
    %c0_i32 = arith.constant 0 : i32
    %c0_i32_0 = arith.constant 0 : i32
    %c0_i32_1 = arith.constant 0 : i32
    return %c0_i32, %c0_i32_0 : i32, i32
  }
  func.func @transform_2(%arg0: i32) -> (i32, i32) {
    %c0_i32 = arith.constant 0 : i32
    %c0_i32_0 = arith.constant 0 : i32
    %c0_i32_1 = arith.constant 0 : i32
    return %c0_i32, %c0_i32_0 : i32, i32
  }
  func.func @transform_3(%arg0: i32) -> (i32, i32) {
    %c0_i32 = arith.constant 0 : i32
    %c0_i32_0 = arith.constant 0 : i32
    %c0_i32_1 = arith.constant 0 : i32
    return %c0_i32, %c0_i32_0 : i32, i32
  }
  func.func @transform_4(%arg0: i32) -> (i32, i32) {
    %c0_i32 = arith.constant 0 : i32
    %c0_i32_0 = arith.constant 0 : i32
    %c0_i32_1 = arith.constant 0 : i32
    return %c0_i32, %c0_i32_0 : i32, i32
  }
  func.func @transform_5(%arg0: i32) -> (i32, i32) {
    %c0_i32 = arith.constant 0 : i32
    %c0_i32_0 = arith.constant 0 : i32
    return %arg0, %c0_i32 : i32, i32
  }
}

</mosaic_0001>

<bundles_post_ra>
// kernel: network_forward.4
= control target key start
LH: loop header
LB: loop body
LE: loop exit
PB: predicated region body
PF: predicated region fallthrough
CT: control target
= control target key end

     0   :  { %vm423_vm0 = vcmask 257024   ;;  %s830_s1 = inlined_call_operand.vmem [shape: bf16[256,32], index: 1, kind: input, shape index: {}]   ;;  %s831_s0 = inlined_call_operand.vmem [shape: bf16[128,256], index: 0, kind: input, shape index: {}]   ;;  %s832_s2 = inlined_call_operand.vmem [shape: f32[1,32], index: 2, kind: input, shape index: {}]   ;;  %s833_s3 = inlined_call_operand.vmem [shape: bf16[128,32], index: 3, kind: output, shape index: {}]  }
   0x1   :  { %v589_v0 = vld [vmem:[%s830_s1 + $0x40] sm:$0xff]   ;;  %v591_v2 = vld [vmem:[%s830_s1 + $0x48] sm:$0xff]   ;;  %v593_v4 = vld [vmem:[%s830_s1 + $0x50] sm:$0xff]  }
   0x2   :  { %v590_v1 = vld [vmem:[%s830_s1] sm:$0xff]   ;;  %509 = vmatprep.subr.bf16.mxu0 %v589_v0  ;;  %573 = vmatprep.subr.bf16.mxu1 %v589_v0  ;;  %v592_v3 = vld [vmem:[%s830_s1 + $0x8] sm:$0xff]   ;;  %v594_v5 = vld [vmem:[%s830_s1 + $0x10] sm:$0xff]  }
   0x3   :  { %510 = vmatpush3.bf16.msra.mxu0 %v590_v1  ;;  %581 = vmatpush3.bf16.msra.mxu1 %v590_v1  ;;  %v595_v6 = vld [vmem:[%s830_s1 + $0x58] sm:$0xff]   ;;  %v597_v8 = vld [vmem:[%s830_s1 + $0x60] sm:$0xff]   ;;  %v599_v10 = vld [vmem:[%s830_s1 + $0x68] sm:$0xff]  }
   0x4   :  { %511 = vmatprep.subr.bf16.mxu0 %v591_v2  ;;  %574 = vmatprep.subr.bf16.mxu1 %v591_v2  ;;  %v596_v7 = vld [vmem:[%s830_s1 + $0x18] sm:$0xff]   ;;  %v598_v9 = vld [vmem:[%s830_s1 + $0x20] sm:$0xff]   ;;  %v600_v13 = vld [vmem:[%s830_s1 + $0x28] sm:$0xff]  }
   0x5   :  { %v607_v11 = vld [vmem:[%s831_s0 + $0x4] ss:$8 sps:$4 sm:$0xff]   ;;  %v601_v14 = vld [vmem:[%s830_s1 + $0x70] sm:$0xff]   ;;  %v603_v16 = vld [vmem:[%s830_s1 + $0x78] sm:$0xff]  }
   0x6   :  { %v610_v12 = vld [vmem:[%s831_s0 + $0x44] ss:$8 sps:$4 sm:$0xff]   ;;  %278 = vmatprep.mubr.bf16.mxu0 %v607_v11  ;;  %v602_v15 = vld [vmem:[%s830_s1 + $0x30] sm:$0xff]   ;;  %v604_v17 = vld [vmem:[%s830_s1 + $0x38] sm:$0xff]  }
   0x7   :  { %512 = vmatpush3.bf16.msra.mxu0 %v592_v3  ;;  %582 = vmatpush3.bf16.msra.mxu1 %v592_v3  ;;  %v605_v18 = vld [vmem:[%s831_s0] ss:$8 sps:$4 sm:$0xff]   ;;  %v611_v20 = vld [vmem:[%s831_s0 + $0x14] ss:$8 sps:$4 sm:$0xff]   ;;  %v615_v22 = vld [vmem:[%s831_s0 + $0x10] ss:$8 sps:$4 sm:$0xff]  }
   0x8   :  { %513 = vmatprep.subr.bf16.mxu0 %v593_v4  ;;  %575 = vmatprep.subr.bf16.mxu1 %v593_v4  ;;  %v608_v19 = vld [vmem:[%s831_s0 + $0x40] ss:$8 sps:$4 sm:$0xff]   ;;  %v613_v21 = vld [vmem:[%s831_s0 + $0x54] ss:$8 sps:$4 sm:$0xff]   ;;  %v616_v23 = vld [vmem:[%s831_s0 + $0x50] ss:$8 sps:$4 sm:$0xff]  }
   0x9   :  { %310 = vmatprep.mubr.bf16.mxu1 %v610_v12  ;;  %v617_v24 = vld [vmem:[%s831_s0 + $0x24] ss:$8 sps:$4 sm:$0xff]   ;;  %v621_v26 = vld [vmem:[%s831_s0 + $0x20] ss:$8 sps:$4 sm:$0xff]   ;;  %v623_v28 = vld [vmem:[%s831_s0 + $0x34] ss:$8 sps:$4 sm:$0xff]  }
   0xa   :  { %v619_v25 = vld [vmem:[%s831_s0 + $0x64] ss:$8 sps:$4 sm:$0xff]   ;;  %v622_v27 = vld [vmem:[%s831_s0 + $0x60] ss:$8 sps:$4 sm:$0xff]   ;;  %v625_v29 = vld [vmem:[%s831_s0 + $0x74] ss:$8 sps:$4 sm:$0xff]  }
   0xb   :  { %514 = vmatpush3.bf16.msra.mxu0 %v594_v5  ;;  %583 = vmatpush3.bf16.msra.mxu1 %v594_v5  ;;  %v627_v30 = vld [vmem:[%s831_s0 + $0x30] ss:$8 sps:$4 sm:$0xff]   ;;  %v748_v34 = vld [vmem:[%s832_s2] ss:$0 sm:$0xff] }
   0xc   :  { %515 = vmatprep.subr.bf16.mxu0 %v595_v6  ;;  %576 = vmatprep.subr.bf16.mxu1 %v595_v6  ;;  %v628_v31 = vld [vmem:[%s831_s0 + $0x70] ss:$8 sps:$4 sm:$0xff]  }
   0xf   :  { %516 = vmatpush3.bf16.msra.mxu0 %v596_v7  ;;  %584 = vmatpush3.bf16.msra.mxu1 %v596_v7 }
  0x10   :  { %517 = vmatprep.subr.bf16.mxu0 %v597_v8  ;;  %577 = vmatprep.subr.bf16.mxu1 %v597_v8 }
  0x13   :  { %518 = vmatpush3.bf16.msra.mxu0 %v598_v9  ;;  %585 = vmatpush3.bf16.msra.mxu1 %v598_v9 }
  0x14   :  { %519 = vmatprep.subr.bf16.mxu0 %v599_v10  ;;  %578 = vmatprep.subr.bf16.mxu1 %v599_v10 }
  0x17   :  { %520 = vmatpush3.bf16.msra.mxu0 %v600_v13  ;;  %586 = vmatpush3.bf16.msra.mxu1 %v600_v13 }
  0x18   :  { %521 = vmatprep.subr.bf16.mxu0 %v601_v14  ;;  %579 = vmatprep.subr.bf16.mxu1 %v601_v14 }
  0x1b   :  { %522 = vmatpush3.bf16.msra.mxu0 %v602_v15  ;;  %587 = vmatpush3.bf16.msra.mxu1 %v602_v15 }
  0x1c   :  { %523 = vmatprep.subr.bf16.mxu0 %v603_v16  ;;  %580 = vmatprep.subr.bf16.mxu1 %v603_v16 }
  0x1f   :  { %524 = vmatpush3.bf16.msra.mxu0 %v604_v17  ;;  %588 = vmatpush3.bf16.msra.mxu1 %v604_v17 }
  0x22   :  { %279 = vmatmul.mubr.bf16.vlgmr.msra.gmra.mrb[0].mxu0 %v605_v18  ;;  %311 = vmatmul.mubr.bf16.vlgmr.msra.gmra.mrb[0].mxu1 %v608_v19 }
  0x23   :  { %286 = vmatprep.mubr.bf16.mxu0 %v611_v20  ;;  %318 = vmatprep.mubr.bf16.mxu1 %v613_v21 }
  0x2a   :  { %287 = vmatmul.mubr.bf16.gmra.mrb[4].mxu0 %v615_v22  ;;  %319 = vmatmul.mubr.bf16.gmra.mrb[4].mxu1 %v616_v23 }
  0x2b   :  { %294 = vmatprep.mubr.bf16.mxu0 %v617_v24  ;;  %326 = vmatprep.mubr.bf16.mxu1 %v619_v25 }
  0x32   :  { %295 = vmatmul.mubr.bf16.gmra.mrb[8].mxu0 %v621_v26  ;;  %327 = vmatmul.mubr.bf16.gmra.mrb[8].mxu1 %v622_v27 }
  0x33   :  { %302 = vmatprep.mubr.bf16.mxu0 %v623_v28  ;;  %334 = vmatprep.mubr.bf16.mxu1 %v625_v29 }
  0x3a   :  { %303 = vmatmul.mubr.bf16.gmra.mrb[12].mxu0 %v627_v30  ;;  %335 = vmatmul.mubr.bf16.gmra.mrb[12].mxu1 %v628_v31 }
  0xf5   :  { %v525_v32 = vpop.f32.mrb[0].mxu0  ;;  %v549_v33 = vpop.f32.mrb[0].mxu1 }
  0xf6   :  { %v526_v35 = vpop.f32.mrb[1].mxu0  ;;  %v550_v36 = vpop.f32.mrb[1].mxu1 }
  0xf7   :  { %v527_v37 = vadd.f32 %v526_v35, %v525_v32  ;;  %v551_v38 = vadd.f32 %v550_v36, %v549_v33  ;;  %v528_v39 = vpop.f32.mrb[2].mxu0  ;;  %v552_v40 = vpop.f32.mrb[2].mxu1 }
  0xf8   :  { %v529_v41 = vpop.f32.mrb[3].mxu0  ;;  %v553_v42 = vpop.f32.mrb[3].mxu1 }
  0xf9   :  { %v281_v43 = vadd.f32 %v527_v37, %v748_v34  ;;  %v313_v44 = vadd.f32 %v551_v38, %v748_v34  ;;  %v530_v45 = vadd.f32 %v529_v41, %v528_v39  ;;  %v554_v46 = vadd.f32 %v553_v42, %v552_v40 }
  0xfb   :  { %v343_v47 = vmax.f32 %v281_v43, 0.0  ;;  %v351_v48 = vmax.f32 %v313_v44, 0.0  ;;  %v284_v49 = vadd.f32 %v530_v45, %v748_v34  ;;  %v316_v50 = vadd.f32 %v554_v46, %v748_v34 }
  0xfd   :  { %v493_v51 = vpack.c.bf16 %v343_v47, %v343_v47  ;;  %v501_v52 = vpack.c.bf16 %v351_v48, %v351_v48  ;;  %v344_v53 = vmax.f32 %v284_v49, 0.0  ;;  %v352_v54 = vmax.f32 %v316_v50, 0.0  ;;  %v531_v55 = vpop.f32.mrb[4].mxu0  ;;  %v555_v56 = vpop.f32.mrb[4].mxu1 }
  0xfe   :  { %v532_v57 = vpop.f32.mrb[5].mxu0  ;;  %v556_v58 = vpop.f32.mrb[5].mxu1 }
  0xff   :  { %424 = vst.msk [vmem:[%s833_s3] sm:$0xf] %vm423_vm0, %v493_v51  ;;  %432 = vst.msk [vmem:[%s833_s3 + $0x20] sm:$0xf] %vm423_vm0, %v501_v52  ;;  %v494_v59 = vpack.c.bf16 %v344_v53, %v344_v53  ;;  %v502_v60 = vpack.c.bf16 %v352_v54, %v352_v54  ;;  %v533_v61 = vadd.f32 %v532_v57, %v531_v55  ;;  %v534_v63 = vpop.f32.mrb[6].mxu0  ;;  %v558_v0 = vpop.f32.mrb[6].mxu1 }
 0x100   :  { %v557_v62 = vadd.f32 %v556_v58, %v555_v56  ;;  %v535_v1 = vpop.f32.mrb[7].mxu0  ;;  %v559_v2 = vpop.f32.mrb[7].mxu1 }
 0x101   :  { %425 = vst.msk [vmem:[%s833_s3 + $0x4] sm:$0xf] %vm423_vm0, %v494_v59  ;;  %433 = vst.msk [vmem:[%s833_s3 + $0x24] sm:$0xf] %vm423_vm0, %v502_v60  ;;  %v289_v3 = vadd.f32 %v533_v61, %v748_v34  ;;  %v536_v5 = vadd.f32 %v535_v1, %v534_v63  ;;  %v560_v6 = vadd.f32 %v559_v2, %v558_v0 }
 0x102   :  { %v321_v4 = vadd.f32 %v557_v62, %v748_v34 }
 0x103   :  { %v345_v7 = vmax.f32 %v289_v3, 0.0  ;;  %v292_v9 = vadd.f32 %v536_v5, %v748_v34  ;;  %v324_v10 = vadd.f32 %v560_v6, %v748_v34 }
 0x104   :  { %v353_v8 = vmax.f32 %v321_v4, 0.0 }
 0x105   :  { %v495_v11 = vpack.c.bf16 %v345_v7, %v345_v7  ;;  %v346_v13 = vmax.f32 %v292_v9, 0.0  ;;  %v354_v14 = vmax.f32 %v324_v10, 0.0  ;;  %v537_v15 = vpop.f32.mrb[8].mxu0  ;;  %v561_v16 = vpop.f32.mrb[8].mxu1 }
 0x106   :  { %v503_v12 = vpack.c.bf16 %v353_v8, %v353_v8  ;;  %v538_v17 = vpop.f32.mrb[9].mxu0  ;;  %v562_v18 = vpop.f32.mrb[9].mxu1 }
 0x107   :  { %426 = vst.msk [vmem:[%s833_s3 + $0x8] sm:$0xf] %vm423_vm0, %v495_v11  ;;  %v496_v19 = vpack.c.bf16 %v346_v13, %v346_v13  ;;  %v504_v20 = vpack.c.bf16 %v354_v14, %v354_v14  ;;  %v539_v21 = vadd.f32 %v538_v17, %v537_v15  ;;  %v563_v22 = vadd.f32 %v562_v18, %v561_v16  ;;  %v540_v23 = vpop.f32.mrb[10].mxu0  ;;  %v564_v24 = vpop.f32.mrb[10].mxu1 }
 0x108   :  { %434 = vst.msk [vmem:[%s833_s3 + $0x28] sm:$0xf] %vm423_vm0, %v503_v12  ;;  %v541_v25 = vpop.f32.mrb[11].mxu0  ;;  %v565_v26 = vpop.f32.mrb[11].mxu1 }
 0x109   :  { %427 = vst.msk [vmem:[%s833_s3 + $0xc] sm:$0xf] %vm423_vm0, %v496_v19  ;;  %435 = vst.msk [vmem:[%s833_s3 + $0x2c] sm:$0xf] %vm423_vm0, %v504_v20  ;;  %v297_v27 = vadd.f32 %v539_v21, %v748_v34  ;;  %v329_v28 = vadd.f32 %v563_v22, %v748_v34  ;;  %v542_v29 = vadd.f32 %v541_v25, %v540_v23 }
 0x10a   :  { %v566_v30 = vadd.f32 %v565_v26, %v564_v24 }
 0x10b   :  { %v347_v31 = vmax.f32 %v297_v27, 0.0  ;;  %v355_v32 = vmax.f32 %v329_v28, 0.0  ;;  %v300_v33 = vadd.f32 %v542_v29, %v748_v34 }
 0x10c   :  { %v332_v35 = vadd.f32 %v566_v30, %v748_v34 }
 0x10d   :  { %v497_v36 = vpack.c.bf16 %v347_v31, %v347_v31  ;;  %v505_v37 = vpack.c.bf16 %v355_v32, %v355_v32  ;;  %v348_v38 = vmax.f32 %v300_v33, 0.0  ;;  %v543_v40 = vpop.f32.mrb[12].mxu0  ;;  %v567_v41 = vpop.f32.mrb[12].mxu1 }
 0x10e   :  { %v356_v39 = vmax.f32 %v332_v35, 0.0  ;;  %v544_v42 = vpop.f32.mrb[13].mxu0  ;;  %v568_v43 = vpop.f32.mrb[13].mxu1 }
 0x10f   :  { %428 = vst.msk [vmem:[%s833_s3 + $0x10] sm:$0xf] %vm423_vm0, %v497_v36  ;;  %436 = vst.msk [vmem:[%s833_s3 + $0x30] sm:$0xf] %vm423_vm0, %v505_v37  ;;  %v498_v44 = vpack.c.bf16 %v348_v38, %v348_v38  ;;  %v545_v46 = vadd.f32 %v544_v42, %v543_v40  ;;  %v569_v47 = vadd.f32 %v568_v43, %v567_v41  ;;  %v546_v48 = vpop.f32.mrb[14].mxu0  ;;  %v570_v49 = vpop.f32.mrb[14].mxu1 }
 0x110   :  { %v506_v45 = vpack.c.bf16 %v356_v39, %v356_v39  ;;  %v547_v50 = vpop.f32.mrb[15].mxu0  ;;  %v571_v51 = vpop.f32.mrb[15].mxu1 }
 0x111   :  { %429 = vst.msk [vmem:[%s833_s3 + $0x14] sm:$0xf] %vm423_vm0, %v498_v44  ;;  %v305_v52 = vadd.f32 %v545_v46, %v748_v34  ;;  %v337_v53 = vadd.f32 %v569_v47, %v748_v34  ;;  %v548_v54 = vadd.f32 %v547_v50, %v546_v48  ;;  %v572_v55 = vadd.f32 %v571_v51, %v570_v49 }
 0x112   :  { %437 = vst.msk [vmem:[%s833_s3 + $0x34] sm:$0xf] %vm423_vm0, %v506_v45 }
 0x113   :  { %v349_v56 = vmax.f32 %v305_v52, 0.0  ;;  %v357_v57 = vmax.f32 %v337_v53, 0.0  ;;  %v308_v58 = vadd.f32 %v548_v54, %v748_v34  ;;  %v340_v59 = vadd.f32 %v572_v55, %v748_v34 }
 0x115   :  { %v499_v60 = vpack.c.bf16 %v349_v56, %v349_v56  ;;  %v507_v61 = vpack.c.bf16 %v357_v57, %v357_v57  ;;  %v350_v62 = vmax.f32 %v308_v58, 0.0  ;;  %v358_v63 = vmax.f32 %v340_v59, 0.0 }
 0x117   :  { %430 = vst.msk [vmem:[%s833_s3 + $0x18] sm:$0xf] %vm423_vm0, %v499_v60  ;;  %438 = vst.msk [vmem:[%s833_s3 + $0x38] sm:$0xf] %vm423_vm0, %v507_v61  ;;  %v500_v0 = vpack.c.bf16 %v350_v62, %v350_v62  ;;  %v508_v1 = vpack.c.bf16 %v358_v63, %v358_v63 }
 0x119   :  { %431 = vst.msk [vmem:[%s833_s3 + $0x1c] sm:$0xf] %vm423_vm0, %v500_v0  ;;  %439 = vst.msk [vmem:[%s833_s3 + $0x3c] sm:$0xf] %vm423_vm0, %v508_v1 }

// kernel: network_forward.5
= control target key start
LH: loop header
LB: loop body
LE: loop exit
PB: predicated region body
PF: predicated region fallthrough
CT: control target
= control target key end

     0   :  { %vm430_vm0 = vcmask 519168   ;;  %vm433_vm1 = vcmask 516096   ;;  %s730_s1 = inlined_call_operand.vmem [shape: bf16[512,64], index: 1, kind: input, shape index: {}]   ;;  %s731_s0 = inlined_call_operand.vmem [shape: bf16[18,512], index: 0, kind: input, shape index: {}]   ;;  %s732_s2 = inlined_call_operand.vmem [shape: f32[1,64], index: 2, kind: input, shape index: {}]   ;;  %s733_s3 = inlined_call_operand.vmem [shape: bf16[18,64], index: 3, kind: output, shape index: {}]  }
   0x1   :  { %v542_v0 = vld [vmem:[%s730_s1 + $0x40] sm:$0xff]   ;;  %v546_v4 = vld [vmem:[%s730_s1 + $0x48] sm:$0xff]   ;;  %v550_v8 = vld [vmem:[%s730_s1 + $0x50] sm:$0xff]  }
   0x2   :  { %v543_v1 = vld [vmem:[%s730_s1 + $0xc0] sm:$0xff]   ;;  %486 = vmatprep.subr.bf16.mxu0 %v542_v0  ;;  %v547_v5 = vld [vmem:[%s730_s1 + $0xc8] sm:$0xff]   ;;  %v551_v9 = vld [vmem:[%s730_s1 + $0xd0] sm:$0xff]  }
   0x3   :  { %v544_v2 = vld [vmem:[%s730_s1] sm:$0xff]   ;;  %514 = vmatprep.subr.bf16.mxu1 %v543_v1  ;;  %v548_v6 = vld [vmem:[%s730_s1 + $0x8] sm:$0xff]   ;;  %v552_v10 = vld [vmem:[%s730_s1 + $0x10] sm:$0xff]  }
   0x4   :  { %v545_v3 = vld [vmem:[%s730_s1 + $0x80] sm:$0xff]   ;;  %487 = vmatpush3.bf16.msra.mxu0 %v544_v2  ;;  %v549_v7 = vld [vmem:[%s730_s1 + $0x88] sm:$0xff]   ;;  %v553_v11 = vld [vmem:[%s730_s1 + $0x90] sm:$0xff]  }
   0x5   :  { %515 = vmatpush3.bf16.msra.mxu1 %v545_v3  ;;  %488 = vmatprep.subr.bf16.mxu0 %v546_v4  ;;  %v554_v12 = vld [vmem:[%s730_s1 + $0x58] sm:$0xff]   ;;  %v558_v16 = vld [vmem:[%s730_s1 + $0x60] sm:$0xff]   ;;  %v562_v20 = vld [vmem:[%s730_s1 + $0x68] sm:$0xff]  }
   0x6   :  { %516 = vmatprep.subr.bf16.mxu1 %v547_v5  ;;  %v555_v13 = vld [vmem:[%s730_s1 + $0xd8] sm:$0xff]   ;;  %v559_v17 = vld [vmem:[%s730_s1 + $0xe0] sm:$0xff]   ;;  %v563_v21 = vld [vmem:[%s730_s1 + $0xe8] sm:$0xff]  }
   0x7   :  { %v556_v14 = vld [vmem:[%s730_s1 + $0x18] sm:$0xff]   ;;  %v560_v18 = vld [vmem:[%s730_s1 + $0x20] sm:$0xff]   ;;  %v564_v22 = vld [vmem:[%s730_s1 + $0x28] sm:$0xff]  }
   0x8   :  { %489 = vmatpush3.bf16.msra.mxu0 %v548_v6  ;;  %v557_v15 = vld [vmem:[%s730_s1 + $0x98] sm:$0xff]   ;;  %v561_v19 = vld [vmem:[%s730_s1 + $0xa0] sm:$0xff]   ;;  %v565_v23 = vld [vmem:[%s730_s1 + $0xa8] sm:$0xff]  }
   0x9   :  { %517 = vmatpush3.bf16.msra.mxu1 %v549_v7  ;;  %490 = vmatprep.subr.bf16.mxu0 %v550_v8  ;;  %v566_v24 = vld [vmem:[%s730_s1 + $0x70] sm:$0xff]   ;;  %v570_v28 = vld [vmem:[%s730_s1 + $0x78] sm:$0xff]   ;;  %v19_v36 = vld [vmem:[%s731_s0 + $0x20] sm:$0x11] }
   0xa   :  { %518 = vmatprep.subr.bf16.mxu1 %v551_v9  ;;  %v567_v25 = vld [vmem:[%s730_s1 + $0xf0] sm:$0xff]   ;;  %v571_v29 = vld [vmem:[%s730_s1 + $0xf8] sm:$0xff]   ;;  %v445_v37 = vcombine.high %v19_v36, %v19_v36  ;;  %v20_v38 = vld [vmem:[%s731_s0 + $0x28] sm:$0x11]  ;;  %v444_v40 = vcombine.low %v19_v36, %v19_v36 }
   0xb   :  { %v568_v26 = vld [vmem:[%s730_s1 + $0x30] sm:$0xff]   ;;  %v572_v30 = vld [vmem:[%s730_s1 + $0x38] sm:$0xff]   ;;  %v447_v39 = vcombine.high %v20_v38, %v20_v38  ;;  %v446_v41 = vcombine.low %v20_v38, %v20_v38  ;;  %v439_v44 = vld [vmem:[%s732_s2] ss:$0 sm:$0xff] }
   0xc   :  { %491 = vmatpush3.bf16.msra.mxu0 %v552_v10  ;;  %v569_v27 = vld [vmem:[%s730_s1 + $0xb0] sm:$0xff]   ;;  %v573_v31 = vld [vmem:[%s730_s1 + $0xb8] sm:$0xff]  }
   0xd   :  { %519 = vmatpush3.bf16.msra.mxu1 %v553_v11  ;;  %492 = vmatprep.subr.bf16.mxu0 %v554_v12  ;;  %v574_v32 = vld [vmem:[%s731_s0] ss:$16 sps:$4 sm:$0xff]   ;;  %v576_v33 = vld [vmem:[%s731_s0 + $0x4] ss:$16 sps:$4 sm:$0xff]   ;;  %v577_v34 = vld [vmem:[%s731_s0 + $0x8] ss:$16 sps:$4 sm:$0xff]  }
   0xe   :  { %520 = vmatprep.subr.bf16.mxu1 %v555_v13  ;;  %v579_v35 = vld [vmem:[%s731_s0 + $0xc] ss:$16 sps:$4 sm:$0xff]   ;;  %350 = vmatprep.mubr.bf16.mxu0 %v576_v33 }
   0xf   :  { %398 = vmatprep.mubr.bf16.mxu1 %v579_v35 }
  0x10   :  { %493 = vmatpush3.bf16.msra.mxu0 %v556_v14 }
  0x11   :  { %521 = vmatpush3.bf16.msra.mxu1 %v557_v15  ;;  %494 = vmatprep.subr.bf16.mxu0 %v558_v16 }
  0x12   :  { %522 = vmatprep.subr.bf16.mxu1 %v559_v17 }
  0x14   :  { %495 = vmatpush3.bf16.msra.mxu0 %v560_v18 }
  0x15   :  { %523 = vmatpush3.bf16.msra.mxu1 %v561_v19  ;;  %496 = vmatprep.subr.bf16.mxu0 %v562_v20 }
  0x16   :  { %524 = vmatprep.subr.bf16.mxu1 %v563_v21 }
  0x18   :  { %497 = vmatpush3.bf16.msra.mxu0 %v564_v22 }
  0x19   :  { %525 = vmatpush3.bf16.msra.mxu1 %v565_v23  ;;  %498 = vmatprep.subr.bf16.mxu0 %v566_v24 }
  0x1a   :  { %526 = vmatprep.subr.bf16.mxu1 %v567_v25 }
  0x1c   :  { %499 = vmatpush3.bf16.msra.mxu0 %v568_v26 }
  0x1d   :  { %527 = vmatpush3.bf16.msra.mxu1 %v569_v27  ;;  %500 = vmatprep.subr.bf16.mxu0 %v570_v28 }
  0x1e   :  { %528 = vmatprep.subr.bf16.mxu1 %v571_v29 }
  0x20   :  { %501 = vmatpush3.bf16.msra.mxu0 %v572_v30 }
  0x21   :  { %529 = vmatpush3.bf16.msra.mxu1 %v573_v31 }
  0x23   :  { %351 = vmatmul.mubr.bf16.vlgmr.msra.gmra.mrb[0].mxu0 %v574_v32 }
  0x24   :  { %399 = vmatmul.mubr.bf16.vlgmr.msra.gmra.mrb[0].mxu1 %v577_v34  ;;  %358 = vmatprep.mubr.bf16.mxu0 %v445_v37 }
  0x25   :  { %406 = vmatprep.mubr.bf16.mxu1 %v447_v39 }
  0x2b   :  { %359 = vmatmul.mubr.bf16.gmra.mrb[4].mxu0 %v444_v40 }
  0x2c   :  { %407 = vmatmul.mubr.bf16.gmra.mrb[4].mxu1 %v446_v41 }
  0xf6   :  { %v502_v42 = vpop.f32.mrb[0].mxu0 }
  0xf7   :  { %v530_v43 = vpop.f32.mrb[0].mxu1  ;;  %v503_v45 = vpop.f32.mrb[1].mxu0 }
  0xf8   :  { %v504_v46 = vadd.f32 %v503_v45, %v502_v42  ;;  %v531_v47 = vpop.f32.mrb[1].mxu1  ;;  %v505_v48 = vpop.f32.mrb[2].mxu0 }
  0xf9   :  { %v532_v49 = vadd.f32 %v531_v47, %v530_v43  ;;  %v533_v50 = vpop.f32.mrb[2].mxu1  ;;  %v506_v51 = vpop.f32.mrb[3].mxu0 }
  0xfa   :  { %v353_v52 = vadd.f32 %v504_v46, %v439_v44  ;;  %v507_v53 = vadd.f32 %v506_v51, %v505_v48  ;;  %v534_v54 = vpop.f32.mrb[3].mxu1 }
  0xfb   :  { %v535_v55 = vadd.f32 %v534_v54, %v533_v50 }
  0xfc   :  { %v401_v56 = vadd.f32 %v532_v49, %v353_v52  ;;  %v356_v57 = vadd.f32 %v507_v53, %v439_v44 }
  0xfe   :  { %v414_v58 = vmax.f32 %v401_v56, 0.0  ;;  %v404_v59 = vadd.f32 %v535_v55, %v356_v57  ;;  %v508_v60 = vpop.f32.mrb[4].mxu0 }
  0xff   :  { %v536_v61 = vpop.f32.mrb[4].mxu1  ;;  %v509_v62 = vpop.f32.mrb[5].mxu0 }
 0x100   :  { %v483_v63 = vpack.c.bf16 %v414_v58, %v414_v58  ;;  %v415_v0 = vmax.f32 %v404_v59, 0.0  ;;  %v510_v1 = vadd.f32 %v509_v62, %v508_v60  ;;  %v537_v2 = vpop.f32.mrb[5].mxu1  ;;  %v511_v3 = vpop.f32.mrb[6].mxu0 }
 0x101   :  { %v538_v4 = vadd.f32 %v537_v2, %v536_v61  ;;  %v539_v5 = vpop.f32.mrb[6].mxu1  ;;  %v512_v6 = vpop.f32.mrb[7].mxu0 }
 0x102   :  { %431 = vst.msk [vmem:[%s733_s3] sm:$0xf] %vm430_vm0, %v483_v63  ;;  %v484_v7 = vpack.c.bf16 %v415_v0, %v415_v0  ;;  %v361_v8 = vadd.f32 %v510_v1, %v439_v44  ;;  %v540_v9 = vpop.f32.mrb[7].mxu1 }
 0x104   :  { %432 = vst.msk [vmem:[%s733_s3 + $0x4] sm:$0xf] %vm430_vm0, %v484_v7  ;;  %v409_v10 = vadd.f32 %v538_v4, %v361_v8 }
 0x106   :  { %v416_v11 = vmax.f32 %v409_v10, 0.0 }
 0x108   :  { %v485_v12 = vpack.c.bf16 %v416_v11, %v416_v11 }
 0x10a   :  { %434 = vst.msk [vmem:[%s733_s3 + $0x8] sm:$0x1] %vm433_vm1, %v485_v12 }

// kernel: network_forward.6
= control target key start
LH: loop header
LB: loop body
LE: loop exit
PB: predicated region body
PF: predicated region fallthrough
CT: control target
= control target key end

     0   :  { %v626_v21 = vmov 1966171168   ;;  %v100_v23 = vlaneseq  ;;  %v627_v40 = vmov 0.0   ;;  %vm628_vm0 = vmmov 0   ;;  %s766_s1 = inlined_call_operand.vmem [shape: bf16[576,64], index: 1, kind: input, shape index: {}]   ;;  %s767_s0 = inlined_call_operand.vmem [shape: bf16[2,576], index: 0, kind: input, shape index: {}]   ;;  %s768_s2 = inlined_call_operand.vmem [shape: f32[1,64], index: 2, kind: input, shape index: {}]   ;;  %s769_s3 = inlined_call_operand.vmem [shape: bf16[2,64], index: 3, kind: output, shape index: {}]  }
   0x1   :  { %v589_v0 = vld [vmem:[%s766_s1 + $0x40] sm:$0xff]   ;;  %v593_v4 = vld [vmem:[%s766_s1 + $0x48] sm:$0xff]   ;;  %v597_v8 = vld [vmem:[%s766_s1 + $0x50] sm:$0xff]   ;;  %v98_v22 = vunpack.c.l.s4 %v626_v21  ;;  %vm355_vm1 = vcmask 523264   ;;  %vm481_vm2 = vcmask 516096  }
   0x2   :  { %v590_v1 = vld [vmem:[%s766_s1] sm:$0xff]   ;;  %525 = vmatprep.subr.bf16.mxu0 %v589_v0  ;;  %v594_v5 = vld [vmem:[%s766_s1 + $0x8] sm:$0xff]   ;;  %v598_v9 = vld [vmem:[%s766_s1 + $0x10] sm:$0xff]   ;;  %v101_v29 = vshrl.u32 %v100_v23, 7 }
   0x3   :  { %v591_v2 = vld [vmem:[%s766_s1 + $0xc0] sm:$0xff]   ;;  %526 = vmatpush3.bf16.msra.mxu0 %v590_v1  ;;  %v595_v6 = vld [vmem:[%s766_s1 + $0xc8] sm:$0xff]   ;;  %v599_v10 = vld [vmem:[%s766_s1 + $0xd0] sm:$0xff]   ;;  %v99_v28 = vunpack.c.0.s8 %v98_v22 }
   0x4   :  { %v592_v3 = vld [vmem:[%s766_s1 + $0x80] sm:$0xff]   ;;  %547 = vmatprep.subr.bf16.mxu1 %v591_v2  ;;  %527 = vmatprep.subr.bf16.mxu0 %v593_v4  ;;  %v596_v7 = vld [vmem:[%s766_s1 + $0x88] sm:$0xff]   ;;  %v600_v11 = vld [vmem:[%s766_s1 + $0x90] sm:$0xff]  }
   0x5   :  { %548 = vmatpush3.bf16.msra.mxu1 %v592_v3  ;;  %v601_v12 = vld [vmem:[%s766_s1 + $0x58] sm:$0xff]   ;;  %v605_v16 = vld [vmem:[%s766_s1 + $0x60] sm:$0xff]   ;;  %v609_v20 = vld [vmem:[%s766_s1 + $0x68] sm:$0xff]   ;;  %v102_v34 = vsub.s32 %v99_v28, %v101_v29 }
   0x6   :  { %549 = vmatprep.subr.bf16.mxu1 %v595_v6  ;;  %v602_v13 = vld [vmem:[%s766_s1 + $0x18] sm:$0xff]   ;;  %v606_v17 = vld [vmem:[%s766_s1 + $0x20] sm:$0xff]   ;;  %v610_v24 = vld [vmem:[%s766_s1 + $0x28] sm:$0xff]  }
   0x7   :  { %528 = vmatpush3.bf16.msra.mxu0 %v594_v5  ;;  %v603_v14 = vld [vmem:[%s766_s1 + $0xd8] sm:$0xff]   ;;  %v607_v18 = vld [vmem:[%s766_s1 + $0xe0] sm:$0xff]   ;;  %v611_v25 = vld [vmem:[%s766_s1 + $0xe8] sm:$0xff]  }
   0x8   :  { %529 = vmatprep.subr.bf16.mxu0 %v597_v8  ;;  %v604_v15 = vld [vmem:[%s766_s1 + $0x98] sm:$0xff]   ;;  %v608_v19 = vld [vmem:[%s766_s1 + $0xa0] sm:$0xff]   ;;  %v612_v26 = vld [vmem:[%s766_s1 + $0xa8] sm:$0xff]  }
   0x9   :  { %550 = vmatpush3.bf16.msra.mxu1 %v596_v7  ;;  %v613_v27 = vld [vmem:[%s766_s1 + $0x70] sm:$0xff]   ;;  %v617_v33 = vld [vmem:[%s766_s1 + $0x78] sm:$0xff]   ;;  %v15_v37 = vld [vmem:[%s767_s0] sm:$0x1f] }
   0xa   :  { %551 = vmatprep.subr.bf16.mxu1 %v599_v10  ;;  %v614_v30 = vld [vmem:[%s766_s1 + $0x30] sm:$0xff]   ;;  %v618_v35 = vld [vmem:[%s766_s1 + $0x38] sm:$0xff]   ;;  %v103_v38 = vrot.slane %v15_v37, %v102_v34  ;;  %v622_v44 = vld [vmem:[%s766_s1 + $0x100] sm:$0xff]   ;;  %v96_v48 = vcombine.high %v15_v37, %v15_v37 }
   0xb   :  { %530 = vmatpush3.bf16.msra.mxu0 %v598_v9  ;;  %v615_v31 = vld [vmem:[%s766_s1 + $0xf0] sm:$0xff]   ;;  %v619_v36 = vld [vmem:[%s766_s1 + $0xf8] sm:$0xff]   ;;  %v623_v47 = vld [vmem:[%s766_s1 + $0x108] sm:$0xff]  }
   0xc   :  { %531 = vmatprep.subr.bf16.mxu0 %v601_v12  ;;  %v616_v32 = vld [vmem:[%s766_s1 + $0xb0] sm:$0xff]   ;;  %v621_v39 = vld [vmem:[%s766_s1 + $0xb8] sm:$0xff]   ;;  %v111_v41 = vcombine.high %v103_v38, %v103_v38  ;;  %v118_v42 = vrot.slane %v103_v38, %v102_v34  ;;  %v110_v50 = vrot.slane %v96_v48, %v102_v34  ;;  %v487_v54 = vld [vmem:[%s768_s2] ss:$0 sm:$0xff] }
   0xd   :  { %552 = vmatpush3.bf16.msra.mxu1 %v600_v11  ;;  %v624_v49 = vld [vmem:[%s766_s1 + $0x110] sm:$0xff]   ;;  %v625_v51 = vld [vmem:[%s766_s1 + $0x118] sm:$0xff]  }
   0xe   :  { %553 = vmatprep.subr.bf16.mxu1 %v603_v14  ;;  %v132_v43 = vrot.slane %v111_v41, %v102_v34  ;;  %v133_v45 = vcombine.high %v118_v42, %v118_v42  ;;  %v125_v52 = vrot.slane %v110_v50, %v102_v34 }
   0xf   :  { %532 = vmatpush3.bf16.msra.mxu0 %v602_v13 }
  0x10   :  { %533 = vmatprep.subr.bf16.mxu0 %v605_v16  ;;  %391 = vmatprep.mubr.bf16.mxu0 %v132_v43  ;;  %v134_v46 = vcombine.high %v132_v43, %v132_v43 }
  0x11   :  { %554 = vmatpush3.bf16.msra.mxu1 %v604_v15 }
  0x12   :  { %555 = vmatprep.subr.bf16.mxu1 %v607_v18  ;;  %431 = vmatprep.mubr.bf16.mxu1 %v134_v46 }
  0x13   :  { %534 = vmatpush3.bf16.msra.mxu0 %v606_v17 }
  0x14   :  { %535 = vmatprep.subr.bf16.mxu0 %v609_v20 }
  0x15   :  { %556 = vmatpush3.bf16.msra.mxu1 %v608_v19 }
  0x16   :  { %557 = vmatprep.subr.bf16.mxu1 %v611_v25 }
  0x17   :  { %536 = vmatpush3.bf16.msra.mxu0 %v610_v24 }
  0x18   :  { %537 = vmatprep.subr.bf16.mxu0 %v613_v27 }
  0x19   :  { %558 = vmatpush3.bf16.msra.mxu1 %v612_v26 }
  0x1a   :  { %559 = vmatprep.subr.bf16.mxu1 %v615_v31 }
  0x1b   :  { %538 = vmatpush3.bf16.msra.mxu0 %v614_v30 }
  0x1c   :  { %539 = vmatprep.subr.bf16.mxu0 %v617_v33 }
  0x1d   :  { %560 = vmatpush3.bf16.msra.mxu1 %v616_v32 }
  0x1e   :  { %561 = vmatprep.subr.bf16.mxu1 %v619_v36 }
  0x1f   :  { %540 = vmatpush3.bf16.msra.mxu0 %v618_v35 }
  0x20   :  { %574 = vmatprep.subr.bf16.mxu0 %v627_v40 }
  0x21   :  { %562 = vmatpush3.bf16.msra.mxu1 %v621_v39 }
  0x22   :  { %392 = vmatmul.mubr.bf16.vlgmr.msra.gmra.mrb[0].mxu0 %v118_v42 }
  0x23   :  { %575 = vmatpush3.bf16.msra.mxu0 %v622_v44  ;;  %582 = vmatprep.mubr.msk.bf16.mxu0 %vm628_vm0, %v627_v40 }
  0x24   :  { %432 = vmatmul.mubr.bf16.vlgmr.msra.gmra.mrb[0].mxu1 %v133_v45  ;;  %576 = vmatprep.subr.bf16.mxu0 %v627_v40 }
  0x27   :  { %577 = vmatpush3.bf16.msra.mxu0 %v623_v47 }
  0x28   :  { %578 = vmatprep.subr.bf16.mxu0 %v627_v40 }
  0x2b   :  { %579 = vmatpush3.bf16.msra.mxu0 %v624_v49 }
  0x2c   :  { %580 = vmatprep.subr.bf16.mxu0 %v627_v40 }
  0x2f   :  { %581 = vmatpush3.bf16.msra.mxu0 %v625_v51 }
  0x32   :  { %583 = vmatmul.mubr.msk.bf16.vlgmr.msra.gmra.mrb[4].mxu0 %vm355_vm1, %v125_v52 }
  0xf5   :  { %v541_v53 = vpop.f32.mrb[0].mxu0 }
  0xf6   :  { %v542_v55 = vpop.f32.mrb[1].mxu0 }
  0xf7   :  { %v543_v56 = vadd.f32 %v542_v55, %v541_v53  ;;  %v544_v57 = vpop.f32.mrb[2].mxu0  ;;  %v563_v58 = vpop.f32.mrb[0].mxu1 }
  0xf8   :  { %v545_v59 = vpop.f32.mrb[3].mxu0  ;;  %v564_v60 = vpop.f32.mrb[1].mxu1 }
  0xf9   :  { %v394_v61 = vadd.f32 %v543_v56, %v487_v54  ;;  %v565_v62 = vadd.f32 %v564_v60, %v563_v58  ;;  %v566_v63 = vpop.f32.mrb[2].mxu1 }
  0xfa   :  { %v567_v0 = vpop.f32.mrb[3].mxu1 }
  0xfb   :  { %v434_v1 = vadd.f32 %v565_v62, %v394_v61 }
 0x105   :  { %v473_v2 = vpop.f32.mrb[4].mxu0 }
 0x106   :  { %v474_v3 = vadd.f32 %v473_v2, %v434_v1  ;;  %v584_v4 = vpop.f32.mrb[5].mxu0 }
 0x107   :  { %v476_v5 = vpop.f32.mrb[6].mxu0 }
 0x108   :  { %v479_v6 = vmax.f32 %v474_v3, 0.0  ;;  %v585_v7 = vpop.f32.mrb[7].mxu0 }
 0x10a   :  { %v480_v8 = vpack.c.bf16 %v479_v6, %v479_v6 }
 0x10c   :  { %482 = vst.msk [vmem:[%s769_s3] sm:$0x1] %vm481_vm2, %v480_v8 }

// kernel: network_forward.7
= control target key start
LH: loop header
LB: loop body
LE: loop exit
PB: predicated region body
PF: predicated region fallthrough
CT: control target
= control target key end

     0   :  { %v770_v2 = vmov 0   ;;  %vm141_vm0 = vcmask 523264   ;;  %s967_s0 = inlined_call_operand.vmem [shape: bf16[2,64], index: 0, kind: input, shape index: {}]   ;;  %s968_s1 = inlined_call_operand.vmem [shape: bf16[64,512], index: 1, kind: input, shape index: {}]   ;;  %s969_s2 = inlined_call_operand.vmem [shape: f32[1,512], index: 2, kind: input, shape index: {}]   ;;  %s970_s3 = inlined_call_operand.vmem [shape: bf16[512,128], index: 3, kind: input, shape index: {}]   ;;  %s971_s4 = inlined_call_operand.vmem [shape: f32[1,128], index: 4, kind: input, shape index: {}]   ;;  %s972_s5 = inlined_call_operand.hbm [shape: f32[2,128], index: 5, kind: output, shape index: {}]  }
   0x1   :  { %v690_v0 = vld [vmem:[%s968_s1 + $0x4] ss:$16 sps:$4 sm:$0xff]   ;;  %v692_v1 = vld [vmem:[%s968_s1 + $0xc] ss:$16 sps:$4 sm:$0xff]   ;;  %177 = vmatprep.mubr.bf16.mxu0 %v770_v2  ;;  %218 = vmatprep.mubr.bf16.mxu1 %v770_v2  ;;  %v694_v3 = vld [vmem:[%s968_s1] ss:$16 sps:$4 sm:$0xff]  }
   0x2   :  { %145 = vmatprep.subr.bf16.mxu0 %v690_v0  ;;  %v695_v4 = vld [vmem:[%s968_s1 + $0x8] ss:$16 sps:$4 sm:$0xff]   ;;  %186 = vmatprep.subr.bf16.mxu1 %v692_v1  ;;  %v696_v5 = vld [vmem:[%s968_s1 + $0x24] ss:$16 sps:$4 sm:$0xff]   ;;  %v698_v6 = vld [vmem:[%s968_s1 + $0x2c] ss:$16 sps:$4 sm:$0xff]  }
   0x3   :  { %146 = vmatpush1.bf16.msra.mxu0 %v694_v3  ;;  %187 = vmatpush1.bf16.msra.mxu1 %v695_v4  ;;  %v700_v7 = vld [vmem:[%s968_s1 + $0x20] ss:$16 sps:$4 sm:$0xff]   ;;  %v701_v8 = vld [vmem:[%s968_s1 + $0x28] ss:$16 sps:$4 sm:$0xff]   ;;  %v702_v9 = vld [vmem:[%s968_s1 + $0x44] ss:$16 sps:$4 sm:$0xff]  }
   0x4   :  { %147 = vmatprep.subr.bf16.mxu0 %v696_v5  ;;  %188 = vmatprep.subr.bf16.mxu1 %v698_v6  ;;  %v704_v10 = vld [vmem:[%s968_s1 + $0x4c] ss:$16 sps:$4 sm:$0xff]   ;;  %v706_v11 = vld [vmem:[%s968_s1 + $0x40] ss:$16 sps:$4 sm:$0xff]   ;;  %v707_v12 = vld [vmem:[%s968_s1 + $0x48] ss:$16 sps:$4 sm:$0xff]  }
   0x5   :  { %v708_v13 = vld [vmem:[%s968_s1 + $0x64] ss:$16 sps:$4 sm:$0xff]   ;;  %v710_v14 = vld [vmem:[%s968_s1 + $0x6c] ss:$16 sps:$4 sm:$0xff]   ;;  %v712_v15 = vld [vmem:[%s968_s1 + $0x60] ss:$16 sps:$4 sm:$0xff]  }
   0x6   :  { %v713_v16 = vld [vmem:[%s968_s1 + $0x68] ss:$16 sps:$4 sm:$0xff]   ;;  %v714_v17 = vld [vmem:[%s970_s3 + $0x40] sm:$0xff]   ;;  %v722_v26 = vld [vmem:[%s970_s3 + $0x50] sm:$0xff]  }
   0x7   :  { %148 = vmatpush1.bf16.msra.mxu0 %v700_v7  ;;  %189 = vmatpush1.bf16.msra.mxu1 %v701_v8  ;;  %v715_v18 = vld [vmem:[%s970_s3 + $0xc0] sm:$0xff]   ;;  %v718_v22 = vld [vmem:[%s970_s3 + $0x48] sm:$0xff]   ;;  %v723_v27 = vld [vmem:[%s970_s3 + $0xd0] sm:$0xff]  }
   0x8   :  { %149 = vmatprep.subr.bf16.mxu0 %v702_v9  ;;  %190 = vmatprep.subr.bf16.mxu1 %v704_v10  ;;  %v22_v19 = vld [vmem:[%s967_s0] sm:$0x1]  ;;  %v719_v23 = vld [vmem:[%s970_s3 + $0xc8] sm:$0xff]   ;;  %v724_v28 = vld [vmem:[%s970_s3 + $0x10] sm:$0xff]  }
   0x9   :  { %v716_v20 = vld [vmem:[%s970_s3] sm:$0xff]   ;;  %v720_v24 = vld [vmem:[%s970_s3 + $0x8] sm:$0xff]   ;;  %v725_v29 = vld [vmem:[%s970_s3 + $0x90] sm:$0xff]  }
   0xa   :  { %v717_v21 = vld [vmem:[%s970_s3 + $0x80] sm:$0xff]   ;;  %v721_v25 = vld [vmem:[%s970_s3 + $0x88] sm:$0xff]   ;;  %v726_v30 = vld [vmem:[%s970_s3 + $0x58] sm:$0xff]  }
   0xb   :  { %150 = vmatpush1.bf16.msra.mxu0 %v706_v11  ;;  %191 = vmatpush1.bf16.msra.mxu1 %v707_v12  ;;  %v727_v31 = vld [vmem:[%s970_s3 + $0xd8] sm:$0xff]   ;;  %v730_v34 = vld [vmem:[%s970_s3 + $0x60] sm:$0xff]   ;;  %v734_v38 = vld [vmem:[%s970_s3 + $0x68] sm:$0xff]  }
   0xc   :  { %151 = vmatprep.subr.bf16.mxu0 %v708_v13  ;;  %192 = vmatprep.subr.bf16.mxu1 %v710_v14  ;;  %v728_v32 = vld [vmem:[%s970_s3 + $0x18] sm:$0xff]   ;;  %v731_v35 = vld [vmem:[%s970_s3 + $0xe0] sm:$0xff]   ;;  %v735_v39 = vld [vmem:[%s970_s3 + $0xe8] sm:$0xff]  }
   0xd   :  { %v729_v33 = vld [vmem:[%s970_s3 + $0x98] sm:$0xff]   ;;  %v732_v36 = vld [vmem:[%s970_s3 + $0x20] sm:$0xff]   ;;  %v736_v40 = vld [vmem:[%s970_s3 + $0x28] sm:$0xff]  }
   0xe   :  { %v733_v37 = vld [vmem:[%s970_s3 + $0xa0] sm:$0xff]   ;;  %v737_v41 = vld [vmem:[%s970_s3 + $0xa8] sm:$0xff]  }
   0xf   :  { %152 = vmatpush1.bf16.msra.mxu0 %v712_v15  ;;  %193 = vmatpush1.bf16.msra.mxu1 %v713_v16 }
  0x10   :  { %644 = vmatprep.subr.bf16.mxu0 %v714_v17  ;;  %666 = vmatprep.subr.bf16.mxu1 %v715_v18 }
  0x12   :  { %609 = vmatmul.mubr.msk.bf16.vlgmr.msra.gmra.mrb[0].mxu0 %vm141_vm0, %v22_v19  ;;  %610 = vmatmul.mubr.msk.bf16.vlgmr.msra.gmra.mrb[0].mxu1 %vm141_vm0, %v22_v19 }
  0x13   :  { %645 = vmatpush3.bf16.msra.mxu0 %v716_v20  ;;  %667 = vmatpush3.bf16.msra.mxu1 %v717_v21 }
  0x14   :  { %646 = vmatprep.subr.bf16.mxu0 %v718_v22  ;;  %668 = vmatprep.subr.bf16.mxu1 %v719_v23 }
  0x17   :  { %647 = vmatpush3.bf16.msra.mxu0 %v720_v24  ;;  %669 = vmatpush3.bf16.msra.mxu1 %v721_v25 }
  0x18   :  { %648 = vmatprep.subr.bf16.mxu0 %v722_v26  ;;  %670 = vmatprep.subr.bf16.mxu1 %v723_v27 }
  0x1b   :  { %649 = vmatpush3.bf16.msra.mxu0 %v724_v28  ;;  %671 = vmatpush3.bf16.msra.mxu1 %v725_v29 }
  0x1c   :  { %650 = vmatprep.subr.bf16.mxu0 %v726_v30  ;;  %672 = vmatprep.subr.bf16.mxu1 %v727_v31 }
  0x1f   :  { %651 = vmatpush3.bf16.msra.mxu0 %v728_v32  ;;  %673 = vmatpush3.bf16.msra.mxu1 %v729_v33 }
  0x20   :  { %652 = vmatprep.subr.bf16.mxu0 %v730_v34  ;;  %674 = vmatprep.subr.bf16.mxu1 %v731_v35 }
  0x23   :  { %653 = vmatpush3.bf16.msra.mxu0 %v732_v36  ;;  %675 = vmatpush3.bf16.msra.mxu1 %v733_v37 }
  0x24   :  { %654 = vmatprep.subr.bf16.mxu0 %v734_v38  ;;  %676 = vmatprep.subr.bf16.mxu1 %v735_v39 }
  0x27   :  { %655 = vmatpush3.bf16.msra.mxu0 %v736_v40  ;;  %677 = vmatpush3.bf16.msra.mxu1 %v737_v41 }
  0x28   :  { %10 = vsyncpa [#allocation3], 0  ;;  %v738_v42 = vld [vmem:[%s970_s3 + $0x70] sm:$0xff]   ;;  %v742_v46 = vld [vmem:[%s970_s3 + $0x78] sm:$0xff]   ;;  %v41_v50 = vlaneseq  ;;  %s771_s0 = smov [#allocation2]  }
  0x29   :  { %v739_v43 = vld [vmem:[%s970_s3 + $0xf0] sm:$0xff]   ;;  %656 = vmatprep.subr.bf16.mxu0 %v738_v42  ;;  %v743_v47 = vld [vmem:[%s970_s3 + $0xf8] sm:$0xff]   ;;  %v39_v54 = vld [vmem:[%s969_s2] sm:$0xf]  ;;  %s585_s13 = sshll.u32 %s771_s0, 4  ;;  %s586_s13 = int_to_ptr.vmem [resolvable:$true] %s585_s13 }
  0x2a   :  { %v740_v44 = vld [vmem:[%s970_s3 + $0x30] sm:$0xff]   ;;  %678 = vmatprep.subr.bf16.mxu1 %v739_v43  ;;  %v744_v48 = vld [vmem:[%s970_s3 + $0x38] sm:$0xff]   ;;  %v42_v51 = vshrl.u32 %v41_v50, 7  ;;  %v611_v19 = vld [vmem:[%s971_s4] ss:$0 sm:$0xff]  ;;  %s746_s14 = scalar_lea.vmem %s586_s13, 32  ;;  %p751_p1 = scmp.lt.s32.totalorder %s586_s13, %s586_s13 }
  0x2b   :  { %v741_v45 = vld [vmem:[%s970_s3 + $0xb0] sm:$0xff]   ;;  %657 = vmatpush3.bf16.msra.mxu0 %v740_v44  ;;  %v745_v49 = vld [vmem:[%s970_s3 + $0xb8] sm:$0xff]   ;;  %p747_p0 = scmp.ne.s32.totalorder %s586_s13, %s746_s14  ;;  %p752_p2 = scmp.lt.s32.totalorder %s746_s14, %s746_s14 }
  0x2c   :  { %679 = vmatpush3.bf16.msra.mxu1 %v741_v45  ;;  %658 = vmatprep.subr.bf16.mxu0 %v742_v46  ;;  %v43_v52 = vsub.s32 0, %v42_v51  ;;  %v51_v53 = vsub.s32 2, %v42_v51  ;;  %v47_v55 = vsub.s32 1, %v42_v51  ;;  %v55_v56 = vsub.s32 3, %v42_v51 }
  0x2d   :  { %680 = vmatprep.subr.bf16.mxu1 %v743_v47  ;;  %p753_p3 = por %p752_p2, %p751_p1 }
  0x2e   :  { %v44_v57 = vrot.slane %v39_v54, %v43_v52  ;;  %v52_v58 = vrot.slane %v39_v54, %v51_v53  ;;  %v48_v59 = vrot.slane %v39_v54, %v47_v55  ;;  %v56_v60 = vrot.slane %v39_v54, %v55_v56 }
  0x2f   :  { %659 = vmatpush3.bf16.msra.mxu0 %v744_v48  ;;  %p754_p4 = pnand %p753_p3, %p747_p0 }
  0x30   :  { %681 = vmatpush3.bf16.msra.mxu1 %v745_v49 }
  0xe5   :  { %v179_v61 = vpop.f32.mrb[0].mxu0  ;;  %v220_v62 = vpop.f32.mrb[0].mxu1 }
  0xe6   :  { %v180_v63 = vadd.f32 %v179_v61, %v44_v57  ;;  %v221_v0 = vadd.f32 %v220_v62, %v52_v58  ;;  %v181_v1 = vpop.f32.mrb[1].mxu0  ;;  %v222_v2 = vpop.f32.mrb[1].mxu1 }
  0xe7   :  { %v182_v3 = vadd.f32 %v181_v1, %v48_v59  ;;  %v223_v4 = vadd.f32 %v222_v2, %v56_v60  ;;  %v183_v5 = vpop.f32.mrb[2].mxu0  ;;  %v224_v6 = vpop.f32.mrb[2].mxu1 }
  0xe8   :  { %v227_v7 = vmax.f32 %v180_v63, 0.0  ;;  %v229_v8 = vmax.f32 %v221_v0, 0.0  ;;  %v184_v9 = vpop.f32.mrb[3].mxu0  ;;  %v225_v10 = vpop.f32.mrb[3].mxu1 }
  0xe9   :  { %v228_v11 = vmax.f32 %v182_v3, 0.0  ;;  %v230_v12 = vmax.f32 %v223_v4, 0.0 }
  0xea   :  { %v233_v13 = vpack.c.bf16 %v229_v8, %v229_v8  ;;  %v231_v16 = vpack.c.bf16 %v227_v7, %v227_v7 }
  0xeb   :  { %v232_v14 = vpack.c.bf16 %v228_v11, %v228_v11  ;;  %v234_v15 = vpack.c.bf16 %v230_v12, %v230_v12 }
  0xed   :  { %530 = vmatprep.mubr.bf16.mxu0 %v232_v14  ;;  %570 = vmatprep.mubr.bf16.mxu1 %v234_v15 }
  0xee   :  { %531 = vmatmul.mubr.bf16.vlgmr.msra.gmra.mrb[4].mxu0 %v231_v16  ;;  %571 = vmatmul.mubr.bf16.vlgmr.msra.gmra.mrb[4].mxu1 %v233_v13 }
 0x1c1   :  { %v660_v17 = vpop.f32.mrb[4].mxu0  ;;  %v682_v18 = vpop.f32.mrb[4].mxu1 }
 0x1c2   :  { %v661_v20 = vpop.f32.mrb[5].mxu0  ;;  %v683_v21 = vpop.f32.mrb[5].mxu1 }
 0x1c3   :  { %v662_v22 = vadd.f32 %v661_v20, %v660_v17  ;;  %v684_v23 = vadd.f32 %v683_v21, %v682_v18  ;;  %v663_v24 = vpop.f32.mrb[6].mxu0  ;;  %v685_v25 = vpop.f32.mrb[6].mxu1 }
 0x1c4   :  { %v664_v26 = vpop.f32.mrb[7].mxu0  ;;  %v686_v27 = vpop.f32.mrb[7].mxu1 }
 0x1c5   :  { %v533_v28 = vadd.f32 %v662_v22, %v611_v19 }
 0x1c7   :  { %v573_v29 = vadd.f32 %v684_v23, %v533_v28 }
 0x1c9   :  { %578 = vst [vmem:[#allocation2] sm:$0x3] %v573_v29 }
 0x1ca   :  { %757 = shalt.err (!%p754_p4)
}
 0x1cb   :  { %s758_s16 = scalar_lea.hbm %s972_s5, 32 }
 0x1cc   :  { %p759_p5 = scmp.ne.s32.totalorder %s972_s5, %s758_s16  ;;  %p762_p6 = scmp.lt.u32.totalorder %s758_s16, %s972_s5 }
 0x1ce   :  { %p764_p7 = pnand %p762_p6, %p759_p5 }
 0x1d0   :  { %767 = shalt.err (!%p764_p7)
}
 0x1d1   :  { %588 = dma.vmem_to_hbm [thread:$0]  %s586_s13, 32, %s972_s5, [#allocation3]  }
 0x1d2   :  { %768 = dma.done.wait [#allocation3], 32  }
 0x1d3   :  { %769 = vsyncadd [#allocation3], 4294967264 }
 0x1d4   :  { %592 = vsyncpa [#allocation3], 1 }

</bundles_post_ra>
